<compile_context>
chip_gen: v6e
topology: v6e:2x2x1
jax: 0.10.0
libtpu: 0.0.40
codegen_flags: <defaults>
</compile_context>

<pallas_src>
import numpy as np
import jax
import jax.numpy as jnp
from jax.experimental import pallas as pl
from jax.experimental.pallas import tpu as pltpu


# ------------------------------- Pallas kernel ------------------------------
def _td_kernel(x_ref, s_ref, b_ref, w_ref, bias_ref, perm_ref, o_ref):
    # x_ref    : (1, K4, TP)   input pixels; channel index 4k+g, pixels (r,w) on lanes
    # s_ref    : (K4, 1)       folded BN1 scale (per stage-1 channel k, repeated over g)
    # b_ref    : (K4, 1)       folded BN1 shift
    # w_ref    : (Cout, K4)    merged weight  (conv1 . BN2-scale . conv2)
    # bias_ref : (Cout, 1)     merged bias    (BN2 shift pushed through conv2)
    # perm_ref : (TP, TP)      constant 0/1 source->dest pixel permutation (PatchMerging)
    # o_ref    : (1, Cout, TP) output pixels in natural NCHW (h2, w2) order
    y = jnp.maximum(x_ref[0] * s_ref[...] + b_ref[...], 0.0)            # BN1 + ReLU
    z = jnp.dot(w_ref[...], y, preferred_element_type=jnp.float32)      # (Cout, TP)
    o_ref[0] = (jnp.dot(z, perm_ref[...], preferred_element_type=jnp.float32)
                + bias_ref[...])


# ----------------------------- tile-size selection --------------------------
def _choose_tile(B, H4, W, K4, Cout, budget_bytes):
    """Largest tr (quarter-rows per tile, tr | H4, tr even, tr*W lane-legal)
    whose VMEM footprint fits the budget; prefer >=2 grid steps (v7x megacore)."""
    full = H4 * W
    cands = [tr for tr in range(H4, 1, -1)
             if H4 % tr == 0 and tr % 2 == 0
             and (tr * W == full or (tr * W) % 128 == 0)]
    # tr == H4 always qualifies (H % 8 == 0  =>  H4 even), so cands is non-empty.

    def need(tp):
        # double-buffered in/out blocks + resident constants + in-kernel temps (y, z, store)
        return 4 * (2 * K4 * tp + 2 * Cout * tp + 2 * tp * tp
                    + 2 * (Cout * K4 + 2 * K4 + Cout)
                    + K4 * tp + 2 * Cout * tp)

    fitting = [tr for tr in cands if need(tr * W) <= budget_bytes]
    # TODO(synk): for extreme 4*Cin (K4 >~ 8k) add a K grid axis ("arbitrary")
    # with a VMEM accumulator instead of shrinking the pixel tile.
    pool = fitting if fitting else cands[-1:]
    for tr in pool:                       # largest first; keep both TCs busy on v7x
        if B * (H4 // tr) >= 2:
            return tr
    return pool[0]


# ------------------------------ forward wrapper ------------------------------
def transition_down_forward(x, params, eps=1e-5):
    B, Cin, H, W = x.shape
    Cout2 = params["w2"].shape[1]
    assert H % 8 == 0 and W % 2 == 0, "fused path needs H % 8 == 0 and even W"
    # TODO(synk): general even-H (H % 8 != 0) and PatchMerging's odd-size F.pad
    # branch are not implemented.
    H2, W2, H4 = H // 2, W // 2, H // 4
    K4 = 4 * Cin

    # ---- fold BN1; merge BN2 + both 1x1 convs into (mt, bias2) (all tiny, trace time) ----
    s1 = params["gamma1"] / jnp.sqrt(params["var1"] + eps)
    b1 = params["beta1"] - params["mean1"] * s1
    s2 = params["gamma2"] / jnp.sqrt(params["var2"] + eps)
    b2 = params["beta2"] - params["mean2"] * s2
    w2s = s2[:, None] * params["w2"]                    # BN2 scale folded (no ReLU after BN2)
    # combined channel index 4k+g  (k: stage-1 input channel, g: PatchMerging group)
    m_all = jnp.stack([params["w1"] @ w2s[g::4] for g in range(4)], axis=1)   # (Cin, 4, Cout2)
    mt = jnp.transpose(m_all.reshape(K4, Cout2)).astype(jnp.float32)          # (Cout2, K4)
    bias2 = (b2 @ params["w2"]).reshape(Cout2, 1).astype(jnp.float32)
    s_vec = jnp.repeat(s1, 4).reshape(K4, 1).astype(jnp.float32)
    b_vec = jnp.repeat(b1, 4).reshape(K4, 1).astype(jnp.float32)

    # ---- FREE reshape: channel = 4k+g, pixel = (r, w) with source row g*H4 + r ----
    x_flat = x.astype(jnp.float32).reshape(B, K4, H4 * W)

    # ---- per-generation VMEM budget -> pixel-tile size ----
    try:
        vmem_cap = int(pltpu.get_tpu_info().vmem_capacity_bytes)
    except Exception:
        vmem_cap = 64 * 1024 * 1024                     # v7x per-TC (smallest)
    budget = int(vmem_cap * 0.45)
    vmem_limit = max(32 * 1024 * 1024, int(vmem_cap * 0.75))

    tr = _choose_tile(B, H4, W, K4, Cout2, budget)
    TP = tr * W                                         # pixels per tile (lanes)
    nI = H4 // tr                                       # exact: no padding, no ragged tile

    # ---- constant source->dest pixel permutation within a tile (exact 0/1, f32) ----
    # src = r*W + w  ->  dst = (4*(r//2) + 2*(w%2) + r%2)*W2 + w//2
    r = np.arange(tr).reshape(tr, 1)
    w = np.arange(W).reshape(1, W)
    dst = (4 * (r // 2) + 2 * (w % 2) + (r % 2)) * W2 + (w // 2)
    perm_np = np.zeros((TP, TP), np.float32)
    perm_np[np.arange(TP), dst.reshape(-1)] = 1.0
    perm = jnp.asarray(perm_np)

    # ---- single fused Pallas kernel: BN1 -> ReLU -> matmul(M) -> permute -> +bias2 ----
    out = pl.pallas_call(
        _td_kernel,
        out_shape=jax.ShapeDtypeStruct((B, Cout2, H2 * W2), jnp.float32),
        grid_spec=pltpu.PrefetchScalarGridSpec(
            num_scalar_prefetch=0,
            grid=(B, nI),
            in_specs=[
                pl.BlockSpec((1, K4, TP), lambda b, i: (b, 0, i)),
                pl.BlockSpec((K4, 1), lambda b, i: (0, 0)),
                pl.BlockSpec((K4, 1), lambda b, i: (0, 0)),
                pl.BlockSpec((Cout2, K4), lambda b, i: (0, 0)),
                pl.BlockSpec((Cout2, 1), lambda b, i: (0, 0)),
                pl.BlockSpec((TP, TP), lambda b, i: (0, 0)),
            ],
            out_specs=pl.BlockSpec((1, Cout2, TP), lambda b, i: (b, 0, i)),
        ),
        compiler_params=pltpu.CompilerParams(
            dimension_semantics=("parallel", "parallel"),
            vmem_limit_bytes=vmem_limit),
    )(x_flat, s_vec, b_vec, mt, bias2, perm)

    return out.reshape(B, Cout2, H2, W2)                # free reshape, already NCHW order
    # Note: upres1 (ConvTranspose2d+ReLU) / convpath1 (Conv3x3+BN+ReLU) feed only
    # c11, which the PyTorch forward discards; omitted as dead code.


# ------------------------------ pure-JAX reference ---------------------------
def reference_forward(x, params, eps=1e-5):
    s1 = params["gamma1"] / jnp.sqrt(params["var1"] + eps)
    b1 = params["beta1"] - params["mean1"] * s1
    h = jnp.maximum(x * s1[None, :, None, None] + b1[None, :, None, None], 0.0)
    c1 = jnp.einsum("bchw,co->bohw", h, params["w1"])
    B, C, H, W = c1.shape
    x0 = c1[:, :, 0::2, 0::2]
    x1 = c1[:, :, 1::2, 0::2]
    x2 = c1[:, :, 0::2, 1::2]
    x3 = c1[:, :, 1::2, 1::2]
    xm = jnp.concatenate([x0, x1, x2, x3], axis=-1).reshape(B, 4 * C, H // 2, W // 2)
    s2 = params["gamma2"] / jnp.sqrt(params["var2"] + eps)
    b2 = params["beta2"] - params["mean2"] * s2
    xn = xm * s2[None, :, None, None] + b2[None, :, None, None]
    return jnp.einsum("bchw,co->bohw", xn, params["w2"])


# ------------------------------------ main -----------------------------------
if __name__ == "__main__":
    def make_params(key, Cin, Cout):
        ks = jax.random.split(key, 10)
        return dict(
            # block1.norm : BatchNorm2d(Cin), eval mode
            gamma1=jax.random.uniform(ks[0], (Cin,), jnp.float32, 0.5, 1.5),
            beta1=0.1 * jax.random.normal(ks[1], (Cin,), jnp.float32),
            mean1=0.1 * jax.random.normal(ks[2], (Cin,), jnp.float32),
            var1=jax.random.uniform(ks[3], (Cin,), jnp.float32, 0.5, 1.5),
            # block1.conv : Conv2d(Cin, Cout, 1, bias=False), stored transposed (Cin, Cout)
            w1=0.2 * jax.random.normal(ks[4], (Cin, Cout), jnp.float32),
            # pool1.norm : BatchNorm2d(4*Cout)
            gamma2=jax.random.uniform(ks[5], (4 * Cout,), jnp.float32, 0.5, 1.5),
            beta2=0.1 * jax.random.normal(ks[6], (4 * Cout,), jnp.float32),
            mean2=0.1 * jax.random.normal(ks[7], (4 * Cout,), jnp.float32),
            var2=jax.random.uniform(ks[8], (4 * Cout,), jnp.float32, 0.5, 1.5),
            # pool1.reduction : Conv2d(4*Cout, Cout, 1, bias=False), transposed (4*Cout, Cout)
            w2=0.2 * jax.random.normal(ks[9], (4 * Cout, Cout), jnp.float32),
        )

    key = jax.random.PRNGKey(0)
    k1, k2, k3, k4 = jax.random.split(key, 4)
    fwd = jax.jit(transition_down_forward)

    # primary test (small module-consistent shapes)
    B, Cin, Cout, H, W = 2, 4, 8, 16, 16
    params = make_params(k1, Cin, Cout)
    x = jax.random.normal(k2, (B, Cin, H, W), jnp.float32)
    out = jax.block_until_ready(fwd(x, params))
    ref = reference_forward(x, params)
    assert out.shape == (B, Cout, H // 2, W // 2), out.shape
    assert jnp.allclose(out, ref, rtol=1e-4, atol=1e-4), float(jnp.max(jnp.abs(out - ref)))

    # larger non-square spatial check (review correctness concern on the fused layout)
    Hb, Wb = 24, 40
    params_b = make_params(k3, Cin, Cout)
    xb = jax.random.normal(k4, (B, Cin, Hb, Wb), jnp.float32)
    out_b = jax.block_until_ready(fwd(xb, params_b))
    ref_b = reference_forward(xb, params_b)
    assert out_b.shape == (B, Cout, Hb // 2, Wb // 2), out_b.shape
    assert jnp.allclose(out_b, ref_b, rtol=1e-4, atol=1e-4), float(jnp.max(jnp.abs(out_b - ref_b)))

    print("KERNEL_OK")
</pallas_src>

<mosaic_0001>
module attributes {stable_mosaic.version = 11 : i64} {
  func.func @_td_kernel(%arg0: i32, %arg1: i32, %arg2: memref<1x16x64xf32, #tpu.memory_space<vmem>>, %arg3: memref<16x1xf32, #tpu.memory_space<vmem>>, %arg4: memref<16x1xf32, #tpu.memory_space<vmem>>, %arg5: memref<8x16xf32, #tpu.memory_space<vmem>>, %arg6: memref<8x1xf32, #tpu.memory_space<vmem>>, %arg7: memref<64x64xf32, #tpu.memory_space<vmem>>, %arg8: memref<1x8x64xf32, #tpu.memory_space<vmem>>) attributes {dimension_semantics = [#tpu.dimension_semantics<parallel>, #tpu.dimension_semantics<parallel>], iteration_bounds = array<i64: 2, 1>, scalar_prefetch = 0 : i64, scratch_operands = 0 : i64, tpu.core_type = #tpu.core_type<tc>, window_params = [{transform_indices = @transform_0, window_bounds = array<i64: 1, 16, 64>}, {pipeline_mode = #tpu.pipeline_mode<synchronous>, transform_indices = @transform_1, window_bounds = array<i64: 16, 1>}, {pipeline_mode = #tpu.pipeline_mode<synchronous>, transform_indices = @transform_2, window_bounds = array<i64: 16, 1>}, {pipeline_mode = #tpu.pipeline_mode<synchronous>, transform_indices = @transform_3, window_bounds = array<i64: 8, 16>}, {pipeline_mode = #tpu.pipeline_mode<synchronous>, transform_indices = @transform_4, window_bounds = array<i64: 8, 1>}, {pipeline_mode = #tpu.pipeline_mode<synchronous>, transform_indices = @transform_5, window_bounds = array<i64: 64, 64>}, {transform_indices = @transform_6, window_bounds = array<i64: 1, 8, 64>}]} {
    %c0 = arith.constant 0 : index
    %c0_0 = arith.constant 0 : index
    %c0_1 = arith.constant 0 : index
    %0 = vector.load %arg2[%c0, %c0_0, %c0_1] : memref<1x16x64xf32, #tpu.memory_space<vmem>>, vector<1x16x64xf32>
    %1 = vector.shape_cast %0 : vector<1x16x64xf32> to vector<16x64xf32>
    %c0_2 = arith.constant 0 : index
    %c0_3 = arith.constant 0 : index
    %2 = vector.load %arg3[%c0_2, %c0_3] : memref<16x1xf32, #tpu.memory_space<vmem>>, vector<16x1xf32>
    %3 = vector.broadcast %2 : vector<16x1xf32> to vector<16x64xf32>
    %4 = arith.mulf %1, %3 : vector<16x64xf32>
    %c0_4 = arith.constant 0 : index
    %c0_5 = arith.constant 0 : index
    %5 = vector.load %arg4[%c0_4, %c0_5] : memref<16x1xf32, #tpu.memory_space<vmem>>, vector<16x1xf32>
    %6 = vector.broadcast %5 : vector<16x1xf32> to vector<16x64xf32>
    %7 = arith.addf %4, %6 : vector<16x64xf32>
    %cst = arith.constant 0.000000e+00 : f32
    %8 = vector.broadcast %cst : f32 to vector<16x64xf32>
    %9 = arith.maximumf %7, %8 : vector<16x64xf32>
    %c0_6 = arith.constant 0 : index
    %c0_7 = arith.constant 0 : index
    %10 = vector.load %arg5[%c0_6, %c0_7] : memref<8x16xf32, #tpu.memory_space<vmem>>, vector<8x16xf32>
    %cst_8 = arith.constant dense<0.000000e+00> : vector<8x64xf32>
    %11 = tpu.matmul %10, %9, %cst_8 {dimension_numbers = #tpu.dot_dimension_numbers<[1], [0], [0], [1], [0, 0, 1, 1], [], []>} : vector<8x16xf32>, vector<16x64xf32>, vector<8x64xf32> -> vector<8x64xf32>
    %c0_9 = arith.constant 0 : index
    %c0_10 = arith.constant 0 : index
    %12 = vector.load %arg7[%c0_9, %c0_10] : memref<64x64xf32, #tpu.memory_space<vmem>>, vector<64x64xf32>
    %cst_11 = arith.constant dense<0.000000e+00> : vector<8x64xf32>
    %13 = tpu.matmul %11, %12, %cst_11 {dimension_numbers = #tpu.dot_dimension_numbers<[1], [0], [0], [1], [0, 0, 1, 1], [], []>} : vector<8x64xf32>, vector<64x64xf32>, vector<8x64xf32> -> vector<8x64xf32>
    %c0_12 = arith.constant 0 : index
    %c0_13 = arith.constant 0 : index
    %14 = vector.load %arg6[%c0_12, %c0_13] : memref<8x1xf32, #tpu.memory_space<vmem>>, vector<8x1xf32>
    %15 = vector.broadcast %14 : vector<8x1xf32> to vector<8x64xf32>
    %16 = arith.addf %13, %15 : vector<8x64xf32>
    %c0_14 = arith.constant 0 : index
    %c0_15 = arith.constant 0 : index
    %c0_16 = arith.constant 0 : index
    %17 = vector.load %arg8[%c0_14, %c0_15, %c0_16] : memref<1x8x64xf32, #tpu.memory_space<vmem>>, vector<1x8x64xf32>
    %18 = vector.shape_cast %17 : vector<1x8x64xf32> to vector<8x64xf32>
    %19 = vector.shape_cast %16 : vector<8x64xf32> to vector<1x8x64xf32>
    tpu.vector_store %arg8[%c0_14, %c0_15, %c0_16], %19 {strides = array<i32>} : memref<1x8x64xf32, #tpu.memory_space<vmem>>, vector<1x8x64xf32>,
    return
  }
  func.func @transform_0(%arg0: i32, %arg1: i32) -> (i32, i32, i32) {
    %c0_i32 = arith.constant 0 : i32
    %c0_i32_0 = arith.constant 0 : i32
    return %arg0, %c0_i32, %arg1 : i32, i32, i32
  }
  func.func @transform_1(%arg0: i32, %arg1: i32) -> (i32, i32) {
    %c0_i32 = arith.constant 0 : i32
    %c0_i32_0 = arith.constant 0 : i32
    %c0_i32_1 = arith.constant 0 : i32
    return %c0_i32, %c0_i32_0 : i32, i32
  }
  func.func @transform_2(%arg0: i32, %arg1: i32) -> (i32, i32) {
    %c0_i32 = arith.constant 0 : i32
    %c0_i32_0 = arith.constant 0 : i32
    %c0_i32_1 = arith.constant 0 : i32
    return %c0_i32, %c0_i32_0 : i32, i32
  }
  func.func @transform_3(%arg0: i32, %arg1: i32) -> (i32, i32) {
    %c0_i32 = arith.constant 0 : i32
    %c0_i32_0 = arith.constant 0 : i32
    %c0_i32_1 = arith.constant 0 : i32
    return %c0_i32, %c0_i32_0 : i32, i32
  }
  func.func @transform_4(%arg0: i32, %arg1: i32) -> (i32, i32) {
    %c0_i32 = arith.constant 0 : i32
    %c0_i32_0 = arith.constant 0 : i32
    %c0_i32_1 = arith.constant 0 : i32
    return %c0_i32, %c0_i32_0 : i32, i32
  }
  func.func @transform_5(%arg0: i32, %arg1: i32) -> (i32, i32) {
    %c0_i32 = arith.constant 0 : i32
    %c0_i32_0 = arith.constant 0 : i32
    %c0_i32_1 = arith.constant 0 : i32
    return %c0_i32, %c0_i32_0 : i32, i32
  }
  func.func @transform_6(%arg0: i32, %arg1: i32) -> (i32, i32, i32) {
    %c0_i32 = arith.constant 0 : i32
    %c0_i32_0 = arith.constant 0 : i32
    return %arg0, %c0_i32, %arg1 : i32, i32, i32
  }
}

</mosaic_0001>

<bundles_post_ra>
// kernel: transition_down_forward.1
= control target key start
LH: loop header
LB: loop body
LE: loop exit
PB: predicated region body
PF: predicated region fallthrough
CT: control target
= control target key end

     0   :  { %s696_s21 = smov 0   ;;  %s698_s22 = smov 0   ;;  %s779_s0 = inlined_call_operand.vmem [shape: f32[2,16,64], index: 0, kind: input, shape index: {}]   ;;  %s780_s1 = inlined_call_operand.vmem [shape: f32[16,1], index: 1, kind: input, shape index: {}]   ;;  %s781_s2 = inlined_call_operand.vmem [shape: f32[16,1], index: 2, kind: input, shape index: {}]   ;;  %s782_s3 = inlined_call_operand.vmem [shape: f32[8,16], index: 3, kind: input, shape index: {}]   ;;  %s783_s4 = inlined_call_operand.vmem [shape: f32[8,1], index: 4, kind: input, shape index: {}]   ;;  %s784_s5 = inlined_call_operand.vmem [shape: f32[64,64], index: 5, kind: input, shape index: {}]   ;;  %s785_s6 = inlined_call_operand.vmem [shape: f32[2,8,64], index: 6, kind: output, shape index: {}]  }
   0x1   :  { %s700_s23 = smov 0  }
   0x2 LB: > { %s28_s24 = sadd.s32 1, %s652_s22  ;;  %p558_p0 = scmp.ge.s32.totalorder %s656_s23, 1  ;;  %s656_s23 = sphi %s700_s23, %s16_s23   ;;  %s652_s22 = sphi %s698_s22, %s787_s22   ;;  %s648_s21 = sphi %s696_s21, %s786_s21  }
   0x3   : > { %p30_p1 = scmp.ge.s32.totalorder %s28_s24, 2  ;;  %p231_p2 = scmp.lt.s32.totalorder %s656_s23, 3 }
   0x5   : > { %s789_s24 = smov (%p30_p1, %s28_s24), 0  ;;  %p232_p3 = pnand %p558_p0, %p231_p2 }
   0x6   : > { %p266_p4 = scmp.lt.s32.totalorder (!%p232_p3), %s648_s21, 1 }
   0x7   : > { %235 = sbr.rel (%p232_p3) target bundleno = 538 (0x21a), region = 44 }
   0xc   : > { %v298_v0 = vld [vmem:[%s781_s2 + $0x8] sm:$0xff]  ;;  %v658_v2 = vmov 0   ;;  %v297_v3 = vld [vmem:[%s781_s2] sm:$0xff]  ;;  %v659_v5 = vmov 0.0   ;;  %vm660_vm0 = vmmov 0   ;;  %v395_v7 = vld [vmem:[%s784_s5 + $0x38] sm:$0xff] }
   0xd   : > { %v284_v1 = vld [vmem:[%s780_s1 + $0x8] sm:$0xff]  ;;  %633 = vset.pattern.permute.xlu1 %v658_v2  ;;  %632 = vset.pattern.permute.xlu0 %v658_v2  ;;  %v283_v4 = vld [vmem:[%s780_s1] sm:$0xff]  ;;  %v394_v8 = vld [vmem:[%s784_s5 + $0x30] sm:$0xff]  ;;  %s791_s21 = smov (!%p266_p4, %s648_s21), 1  ;;  %vm314_vm1 = vcmask 130048   ;;  %vm402_vm2 = vcmask 523264  }
   0xe   : > { %306 = vperm.xlu1 %633, %v298_v0   ;;  %292 = vperm.xlu0 %632, %v284_v1   ;;  %v396_v6 = vld [vmem:[%s783_s4] sm:$0xff]  ;;  %v393_v9 = vld [vmem:[%s784_s5 + $0x28] sm:$0xff]  ;;  %v391_v11 = vld [vmem:[%s784_s5 + $0x18] sm:$0xff]  ;;  %s566_s29 = sshll.u32 %s791_s21, 4  ;;  %s561_s13 = sshll.u32 %s791_s21, 3 }
   0xf   : > { %579 = vmatprep.subr.mxu0 %v659_v5  ;;  %586 = vmatprep.subr.mxu1 %v659_v5  ;;  %v392_v10 = vld [vmem:[%s784_s5 + $0x20] sm:$0xff]  ;;  %v390_v12 = vld [vmem:[%s784_s5 + $0x10] sm:$0xff]  ;;  %v389_v13 = vld [vmem:[%s784_s5 + $0x8] sm:$0xff]  ;;  %s273_s8 = scalar_lea.vmem %s779_s0, %s566_s29  ;;  %s280_s16 = scalar_lea.vmem %s785_s6, %s561_s13 }
  0x10   : > { %583 = vmatprep.mubr.msk.f32.mxu0 %vm660_vm0, %v659_v5  ;;  %602 = vmatprep.mubr.msk.f32.mxu1 %vm660_vm0, %v659_v5  ;;  %v282_v14 = vld [vmem:[%s273_s8 + $0x8] sm:$0xff]  ;;  %v281_v18 = vld [vmem:[%s273_s8] sm:$0xff] }
  0x11   : > { %587 = vmatpush3.msra.mxu1 %v395_v7  ;;  %v313_v26 = vld [vmem:[%s782_s3] sm:$0xff] }
  0x12   : > { %301 = vperm.xlu1 %633, %v297_v3   ;;  %287 = vperm.xlu0 %632, %v283_v4   ;;  %v388_v27 = vld [vmem:[%s784_s5] sm:$0xff] }
  0x13   : > { %588 = vmatprep.subr.mxu1 %v659_v5 }
  0x14   : > { %589 = vmatpush3.msra.mxu1 %v394_v8 }
  0x15   : > { %590 = vmatprep.subr.mxu1 %v659_v5 }
  0x16   : > { %399 = vperm.xlu0 %632, %v396_v6   ;;  %591 = vmatpush3.msra.mxu1 %v393_v9 }
  0x17   : > { %592 = vmatprep.subr.mxu1 %v659_v5 }
  0x18   : > { %593 = vmatpush3.msra.mxu1 %v392_v10 }
  0x19   : > { %594 = vmatprep.subr.mxu1 %v659_v5 }
  0x1a   : > { %595 = vmatpush3.msra.mxu1 %v391_v11 }
  0x1b   : > { %596 = vmatprep.subr.mxu1 %v659_v5 }
  0x1c   : > { %597 = vmatpush3.msra.mxu1 %v390_v12 }
  0x1d   : > { %598 = vmatprep.subr.mxu1 %v659_v5 }
  0x1e   : > { %599 = vmatpush3.msra.mxu1 %v389_v13 }
  0x1f   : > { %600 = vmatprep.subr.mxu1 %v659_v5 }
  0x20   : > { %601 = vmatpush3.msra.mxu1 %v388_v27 }
  0x89   : > { %v307_v15 = vpop.permute.xlu1 %306  ;;  %v293_v16 = vpop.permute.xlu0 %292 }
  0x8a   : > { %v296_v17 = vmul.f32 %v293_v16, %v282_v14 }
  0x8c   : > { %v310_v19 = vadd.f32 %v307_v15, %v296_v17 }
  0x8d   : > { %v288_v20 = vpop.permute.xlu0 %287  ;;  %v302_v23 = vpop.permute.xlu1 %301 }
  0x8e   : > { %v295_v21 = vmul.f32 %v288_v20, %v281_v18  ;;  %v312_v22 = vmax.f32 %v310_v19, 0.0 }
  0x90   : > { %v309_v24 = vadd.f32 %v302_v23, %v295_v21  ;;  %580 = vmatpush3.msra.mxu0 %v312_v22 }
  0x91   : > { %581 = vmatprep.subr.mxu0 %v659_v5  ;;  %v400_v30 = vpop.permute.xlu0 %399 }
  0x92   : > { %v311_v25 = vmax.f32 %v309_v24, 0.0 }
  0x94   : > { %582 = vmatpush3.msra.mxu0 %v311_v25 }
  0x95   : > { %584 = vmatmul.mubr.msk.f32.vlgmr.msra.gmra.mxu0 %vm314_vm1, %v313_v26 }
 0x155   : > { %v384_v28 = vpop.f32.mrf.mxu0 }
 0x156   : > { %603 = vmatmul.mubr.msk.f32.vlgmr.msra.gmra.mxu1 %vm402_vm2, %v384_v28 }
 0x157   : > { %v585_v29 = vpop.f32.mrf.mxu0 }
 0x216   : > { %v472_v31 = vpop.f32.mrf.mxu1 }
 0x217   : > { %v473_v32 = vadd.f32 %v472_v31, %v400_v30 }
 0x218   : > { %v604_v33 = vpop.f32.mrf.mxu1 }
 0x219   : > { %476 = vst.msk [vmem:[%s280_s16] sm:$0xff] %vm402_vm2, %v473_v32 }
 0x21a PF: > { %s16_s23 = sadd.s32 1, %s656_s23   ;;  %s786_s21 = smov %s652_s22 }
 0x21b   : > { %p13_p5 = scmp.ge.s32.totalorder %s16_s23, 4   ;;  %s787_s22 = smov %s789_s24 }
 0x21d   :  { %15 = sbr.rel (!%p13_p5) target bundleno = 2 (0x2), region = 74 }

</bundles_post_ra>
